<compile_context>
chip_gen: v5e
topology: v5e:2x2
jax: 0.10.0
libtpu: 0.0.40
codegen_flags: <defaults>
</compile_context>

<pallas_src>
import functools

import jax
import jax.numpy as jnp
from jax import lax
from jax.experimental import pallas as pl
from jax.experimental.pallas import tpu as pltpu


# ---------------------------------------------------------------------------
# Kernel 1: fused QKV projection.  (block_t, C) @ (C, 3C) per grid step, output
# written back in the input dtype so downstream MXU matmuls take the bf16 path.
# ---------------------------------------------------------------------------
def _qkv_proj_kernel(x_ref, w_ref, q_ref, k_ref, v_ref, *, d_model):
    qkv = jnp.dot(x_ref[...], w_ref[...], preferred_element_type=jnp.float32)
    q_ref[...] = qkv[:, :d_model].astype(q_ref.dtype)
    k_ref[...] = qkv[:, d_model:2 * d_model].astype(k_ref.dtype)
    v_ref[...] = qkv[:, 2 * d_model:].astype(v_ref.dtype)


# ---------------------------------------------------------------------------
# Kernel 2: causal attention + output projection for one (batch, query-tile).
# ---------------------------------------------------------------------------
def _attn_kernel(q_ref, k_ref, v_ref, wp_ref, o_ref, *,
                 n_head, head_size, block_q, block_k):
    qi = pl.program_id(1)
    C = n_head * head_size

    q_all = q_ref[...]                       # (block_q, C), input dtype (scale pre-folded)
    dt = q_all.dtype

    # Global positions for the causal mask (hoisted out of all loops).
    q_pos = qi * block_q + lax.broadcasted_iota(jnp.int32, (block_q, block_k), 0)
    k_pos_base = lax.broadcasted_iota(jnp.int32, (block_q, block_k), 1)
    neg_big = jnp.float32(-1e30)             # large finite instead of -inf (NaN-safe)

    # Causal skip: only key tiles intersecting [0, (qi+1)*block_q) are visited.
    nk = ((qi + 1) * block_q + block_k - 1) // block_k

    proj = jnp.zeros((block_q, C), jnp.float32)
    # TODO(synk): for head_size not a multiple of 128 these per-head lane slices cost
    # XLU shuffles; if profiling shows XLU saturation, move to an (n_head, T, Hs)
    # blocked layout or process two 64-wide heads per 128-lane slice.
    for h in range(n_head):                  # small static loop
        hs0 = h * head_size
        q = q_all[:, hs0:hs0 + head_size]    # (block_q, Hs), dt

        def kv_body(kb, carry):
            m_prev, l_prev, acc_prev = carry
            start = pl.multiple_of(kb * block_k, block_k)
            k = k_ref[pl.ds(start, block_k), pl.ds(hs0, head_size)]   # (block_k, Hs), dt
            v = v_ref[pl.ds(start, block_k), pl.ds(hs0, head_size)]   # (block_k, Hs), dt
            # q @ k^T without materializing a transpose: contract the last dims.
            s = lax.dot_general(q, k, (((1,), (1,)), ((), ())),
                                preferred_element_type=jnp.float32)   # (block_q, block_k) f32
            s = jnp.where(start + k_pos_base <= q_pos, s, neg_big)
            m_new = jnp.maximum(m_prev, jnp.max(s, axis=-1, keepdims=True))
            alpha = jnp.exp(m_prev - m_new)
            p = jnp.exp(s - m_new)
            l_new = alpha * l_prev + jnp.sum(p, axis=-1, keepdims=True)
            acc_new = alpha * acc_prev + jnp.dot(p.astype(dt), v,
                                                 preferred_element_type=jnp.float32)
            return m_new, l_new, acc_new

        m0 = jnp.full((block_q, 1), -jnp.inf, jnp.float32)
        l0 = jnp.zeros((block_q, 1), jnp.float32)
        a0 = jnp.zeros((block_q, head_size), jnp.float32)
        _, l_f, acc_f = lax.fori_loop(0, nk, kv_body, (m0, l0, a0))

        out_h = acc_f * pl.reciprocal(l_f, approx=False)              # (block_q, Hs) f32
        # Accumulate the output projection per head (lane-dense N=C): no concat scratch.
        proj = proj + jnp.dot(out_h.astype(dt), wp_ref[pl.ds(hs0, head_size), :],
                              preferred_element_type=jnp.float32)

    o_ref[...] = proj.astype(o_ref.dtype)


def multi_head_attention(x, wq, wk, wv, wproj, *, n_head,
                         block_q=None, block_k=None,
                         vmem_limit_bytes=48 * 1024 * 1024):
    """x: [B,T,C]; wq/wk/wv: [H,C,Hs] (per-head, pre-transposed); wproj: [C,C] (pre-transposed)."""
    B, T, C = x.shape
    assert C % n_head == 0
    head_size = C // n_head
    dt = x.dtype
    itemsize = jnp.dtype(dt).itemsize

    if block_q is None:
        block_q = T if T <= 256 else 256
    if block_k is None:
        block_k = T if T <= 256 else 256
    assert T % block_q == 0 and T % block_k == 0, "T must be divisible by block_q/block_k"
    n_q = T // block_q

    # Pack per-head weights lane-dense: head h -> columns [h*Hs, (h+1)*Hs).
    # Fold the softmax scale C**-0.5 (FULL embed dim, per the source module) into Wq.
    scale = C ** -0.5
    wq_all = (jnp.transpose(wq, (1, 0, 2)).reshape(C, C) * scale).astype(dt)
    wk_all = jnp.transpose(wk, (1, 0, 2)).reshape(C, C).astype(dt)
    wv_all = jnp.transpose(wv, (1, 0, 2)).reshape(C, C).astype(dt)
    w_qkv = jnp.concatenate([wq_all, wk_all, wv_all], axis=1)        # (C, 3C)
    wp = wproj.astype(dt)

    # ---- Kernel 1: QKV projection (computed once; no per-query-tile recompute).
    proj_cost = pl.CostEstimate(
        flops=int(2 * B * T * C * 3 * C),
        transcendentals=0,
        bytes_accessed=int((B * T * C + 3 * C * C + 3 * B * T * C) * itemsize))
    q_all, k_all, v_all = pl.pallas_call(
        functools.partial(_qkv_proj_kernel, d_model=C),
        out_shape=(jax.ShapeDtypeStruct((B, T, C), dt),) * 3,
        grid_spec=pltpu.PrefetchScalarGridSpec(
            num_scalar_prefetch=0,
            grid=(B, n_q),
            in_specs=[
                pl.BlockSpec((None, block_q, C), lambda b, t: (b, t, 0)),
                pl.BlockSpec((C, 3 * C), lambda b, t: (0, 0)),       # constant weight block
            ],
            out_specs=(pl.BlockSpec((None, block_q, C), lambda b, t: (b, t, 0)),) * 3,
        ),
        compiler_params=pltpu.CompilerParams(
            dimension_semantics=("parallel", "parallel"),
            vmem_limit_bytes=vmem_limit_bytes),
        cost_estimate=proj_cost,
    )(x, w_qkv)

    # ---- Kernel 2: causal attention + output projection.
    keys_per_tile = [min(-(-((qi + 1) * block_q) // block_k) * block_k, T)
                     for qi in range(n_q)]
    score_entries = block_q * sum(keys_per_tile)                     # per batch, per head
    attn_cost = pl.CostEstimate(
        flops=int(4 * B * n_head * head_size * score_entries + 2 * B * T * C * C),
        transcendentals=int(B * n_head * score_entries),
        bytes_accessed=int((3 * B * T * C + C * C + B * T * C) * itemsize))

    out = pl.pallas_call(
        functools.partial(_attn_kernel, n_head=n_head, head_size=head_size,
                          block_q=block_q, block_k=block_k),
        out_shape=jax.ShapeDtypeStruct((B, T, C), dt),
        grid_spec=pltpu.PrefetchScalarGridSpec(
            num_scalar_prefetch=0,
            grid=(B, n_q),
            in_specs=[
                pl.BlockSpec((None, block_q, C), lambda b, qi: (b, qi, 0)),  # Q tile
                pl.BlockSpec((None, T, C), lambda b, qi: (b, 0, 0)),         # K (const over qi -> no refetch)
                pl.BlockSpec((None, T, C), lambda b, qi: (b, 0, 0)),         # V
                pl.BlockSpec((C, C), lambda b, qi: (0, 0)),                  # Wproj (constant)
            ],
            out_specs=pl.BlockSpec((None, block_q, C), lambda b, qi: (b, qi, 0)),
        ),
        compiler_params=pltpu.CompilerParams(
            dimension_semantics=("parallel", "parallel"),
            vmem_limit_bytes=vmem_limit_bytes),
        cost_estimate=attn_cost,
    )(q_all, k_all, v_all, wp)
    return out


def _reference(x, wq, wk, wv, wproj, *, n_head):
    """Pure-JAX reference mirroring the PyTorch forward."""
    B, T, C = x.shape
    causal = jnp.tril(jnp.ones((T, T), dtype=bool))
    outs = []
    for h in range(n_head):
        q = x @ wq[h]
        k = x @ wk[h]
        v = x @ wv[h]
        wei = jnp.einsum("btd,bsd->bts", q, k) * (C ** -0.5)
        wei = jnp.where(causal, wei, -jnp.inf)
        wei = jax.nn.softmax(wei, axis=-1)
        outs.append(jnp.einsum("bts,bsd->btd", wei, v))
    cat = jnp.concatenate(outs, axis=-1)
    return cat @ wproj


if __name__ == "__main__":
    # GPT config analogue: n_embd=32, n_head=4, block_size>=T, bias=False, dropout=0.0
    B, T, C, n_head = 2, 16, 32, 4
    head_size = C // n_head

    key = jax.random.PRNGKey(0)
    kx, kq, kk, kv, kp = jax.random.split(key, 5)

    x = jax.random.normal(kx, (B, T, C), dtype=jnp.float32)
    # Per-head Linear weights (PyTorch layout would be (Hs, C)); stored pre-transposed (C, Hs).
    wq = jax.random.normal(kq, (n_head, C, head_size), dtype=jnp.float32) * 0.1
    wk = jax.random.normal(kk, (n_head, C, head_size), dtype=jnp.float32) * 0.1
    wv = jax.random.normal(kv, (n_head, C, head_size), dtype=jnp.float32) * 0.1
    # Output projection (PyTorch (C, C)); stored pre-transposed (C, C).
    wproj = jax.random.normal(kp, (C, C), dtype=jnp.float32) * 0.1

    # block_q = block_k = 8 exercises the multi-tile causal-skip path even at T=16.
    out = multi_head_attention(x, wq, wk, wv, wproj, n_head=n_head,
                               block_q=8, block_k=8)
    out = jax.block_until_ready(out)

    ref = _reference(x, wq, wk, wv, wproj, n_head=n_head)
    assert out.shape == (B, T, C)
    assert jnp.allclose(out, ref, atol=1e-4, rtol=1e-4), "mismatch vs reference"

    print("KERNEL_OK")
</pallas_src>

<mosaic_0001>
module attributes {stable_mosaic.version = 11 : i64} {
  func.func @_qkv_proj_kernel(%arg0: i32, %arg1: i32, %arg2: memref<1x8x32xf32, #tpu.memory_space<vmem>>, %arg3: memref<32x96xf32, #tpu.memory_space<vmem>>, %arg4: memref<1x8x32xf32, #tpu.memory_space<vmem>>, %arg5: memref<1x8x32xf32, #tpu.memory_space<vmem>>, %arg6: memref<1x8x32xf32, #tpu.memory_space<vmem>>) attributes {dimension_semantics = [#tpu.dimension_semantics<parallel>, #tpu.dimension_semantics<parallel>], iteration_bounds = array<i64: 2, 2>, scalar_prefetch = 0 : i64, scratch_operands = 0 : i64, tpu.core_type = #tpu.core_type<tc>, window_params = [{transform_indices = @transform_0, window_bounds = array<i64: 1, 8, 32>}, {pipeline_mode = #tpu.pipeline_mode<synchronous>, transform_indices = @transform_1, window_bounds = array<i64: 32, 96>}, {transform_indices = @transform_2, window_bounds = array<i64: 1, 8, 32>}, {transform_indices = @transform_3, window_bounds = array<i64: 1, 8, 32>}, {transform_indices = @transform_4, window_bounds = array<i64: 1, 8, 32>}]} {
    %c0 = arith.constant 0 : index
    %c0_0 = arith.constant 0 : index
    %c0_1 = arith.constant 0 : index
    %0 = vector.load %arg2[%c0, %c0_0, %c0_1] : memref<1x8x32xf32, #tpu.memory_space<vmem>>, vector<1x8x32xf32>
    %1 = vector.shape_cast %0 : vector<1x8x32xf32> to vector<8x32xf32>
    %c0_2 = arith.constant 0 : index
    %c0_3 = arith.constant 0 : index
    %2 = vector.load %arg3[%c0_2, %c0_3] : memref<32x96xf32, #tpu.memory_space<vmem>>, vector<32x96xf32>
    %cst = arith.constant dense<0.000000e+00> : vector<8x96xf32>
    %3 = tpu.matmul %1, %2, %cst {dimension_numbers = #tpu.dot_dimension_numbers<[1], [0], [0], [1], [0, 0, 1, 1], [], []>} : vector<8x32xf32>, vector<32x96xf32>, vector<8x96xf32> -> vector<8x96xf32>
    %4 = vector.extract_strided_slice %3 {offsets = [0, 0], sizes = [8, 32], strides = [1, 1]} : vector<8x96xf32> to vector<8x32xf32>
    %c0_4 = arith.constant 0 : index
    %c0_5 = arith.constant 0 : index
    %c0_6 = arith.constant 0 : index
    %5 = vector.load %arg4[%c0_4, %c0_5, %c0_6] : memref<1x8x32xf32, #tpu.memory_space<vmem>>, vector<1x8x32xf32>
    %6 = vector.shape_cast %5 : vector<1x8x32xf32> to vector<8x32xf32>
    %7 = vector.shape_cast %4 : vector<8x32xf32> to vector<1x8x32xf32>
    tpu.vector_store %arg4[%c0_4, %c0_5, %c0_6], %7 {strides = array<i32>} : memref<1x8x32xf32, #tpu.memory_space<vmem>>, vector<1x8x32xf32>,
    %8 = vector.extract_strided_slice %3 {offsets = [0, 32], sizes = [8, 32], strides = [1, 1]} : vector<8x96xf32> to vector<8x32xf32>
    %c0_7 = arith.constant 0 : index
    %c0_8 = arith.constant 0 : index
    %c0_9 = arith.constant 0 : index
    %9 = vector.load %arg5[%c0_7, %c0_8, %c0_9] : memref<1x8x32xf32, #tpu.memory_space<vmem>>, vector<1x8x32xf32>
    %10 = vector.shape_cast %9 : vector<1x8x32xf32> to vector<8x32xf32>
    %11 = vector.shape_cast %8 : vector<8x32xf32> to vector<1x8x32xf32>
    tpu.vector_store %arg5[%c0_7, %c0_8, %c0_9], %11 {strides = array<i32>} : memref<1x8x32xf32, #tpu.memory_space<vmem>>, vector<1x8x32xf32>,
    %12 = vector.extract_strided_slice %3 {offsets = [0, 64], sizes = [8, 32], strides = [1, 1]} : vector<8x96xf32> to vector<8x32xf32>
    %c0_10 = arith.constant 0 : index
    %c0_11 = arith.constant 0 : index
    %c0_12 = arith.constant 0 : index
    %13 = vector.load %arg6[%c0_10, %c0_11, %c0_12] : memref<1x8x32xf32, #tpu.memory_space<vmem>>, vector<1x8x32xf32>
    %14 = vector.shape_cast %13 : vector<1x8x32xf32> to vector<8x32xf32>
    %15 = vector.shape_cast %12 : vector<8x32xf32> to vector<1x8x32xf32>
    tpu.vector_store %arg6[%c0_10, %c0_11, %c0_12], %15 {strides = array<i32>} : memref<1x8x32xf32, #tpu.memory_space<vmem>>, vector<1x8x32xf32>,
    return
  }
  func.func @transform_0(%arg0: i32, %arg1: i32) -> (i32, i32, i32) {
    %c0_i32 = arith.constant 0 : i32
    %c0_i32_0 = arith.constant 0 : i32
    return %arg0, %arg1, %c0_i32 : i32, i32, i32
  }
  func.func @transform_1(%arg0: i32, %arg1: i32) -> (i32, i32) {
    %c0_i32 = arith.constant 0 : i32
    %c0_i32_0 = arith.constant 0 : i32
    %c0_i32_1 = arith.constant 0 : i32
    return %c0_i32, %c0_i32_0 : i32, i32
  }
  func.func @transform_2(%arg0: i32, %arg1: i32) -> (i32, i32, i32) {
    %c0_i32 = arith.constant 0 : i32
    %c0_i32_0 = arith.constant 0 : i32
    return %arg0, %arg1, %c0_i32 : i32, i32, i32
  }
  func.func @transform_3(%arg0: i32, %arg1: i32) -> (i32, i32, i32) {
    %c0_i32 = arith.constant 0 : i32
    %c0_i32_0 = arith.constant 0 : i32
    return %arg0, %arg1, %c0_i32 : i32, i32, i32
  }
  func.func @transform_4(%arg0: i32, %arg1: i32) -> (i32, i32, i32) {
    %c0_i32 = arith.constant 0 : i32
    %c0_i32_0 = arith.constant 0 : i32
    return %arg0, %arg1, %c0_i32 : i32, i32, i32
  }
}

</mosaic_0001>

<bundles_post_ra>
// kernel: tpu_custom_call.1
= control target key start
LH: loop header
LB: loop body
LE: loop exit
PB: predicated region body
PF: predicated region fallthrough
CT: control target
= control target key end

     0   :  { %s1131_s0 = inlined_call_operand.hbm [shape: f32[2,16,32], index: 0, kind: input, shape index: {}]   ;;  %s1132_s1 = inlined_call_operand.hbm [shape: f32[32,96], index: 1, kind: input, shape index: {}]   ;;  %s1133_s2 = inlined_call_operand.hbm [shape: f32[2,16,32], index: 2, kind: output, shape index: {0}]   ;;  %s1134_s3 = inlined_call_operand.hbm [shape: f32[2,16,32], index: 3, kind: output, shape index: {1}]   ;;  %s1135_s4 = inlined_call_operand.hbm [shape: f32[2,16,32], index: 4, kind: output, shape index: {2}]  }
   0x1   :  { %1142 = sst [smem:[#allocation19_spill]] %s1132_s1 }
   0x2   :  { %1143 = sst [smem:[#allocation20_spill]] %s1135_s4 }
   0x3   :  { %10 = vsyncpa [#allocation3], 0 }
   0x4   :  { %12 = vsyncpa [#allocation3 + $0x1], 0 }
   0x5   :  { %13 = vsyncpa [#allocation6], 0 }
   0x6   :  { %14 = vsyncpa [#allocation4], 0 }
   0x7   :  { %16 = vsyncpa [#allocation4 + $0x1], 0 }
   0x8   :  { %17 = vsyncpa [#allocation9], 0 }
   0x9   :  { %19 = vsyncpa [#allocation9 + $0x1], 0  ;;  %s916_s15 = smov 0   ;;  %s918_s16 = smov 0  }
   0xa   :  { %s920_s17 = smov 0   ;;  %s922_s18 = smov 0  }
   0xb   :  { %s924_s19 = smov 0   ;;  %s926_s20 = smov 0  }
   0xc   :  { %s928_s21 = smov 0   ;;  %s930_s22 = smov 0  }
   0xd LB: > { %1144 = sst [smem:[#allocation15_spill]] %s856_s15  ;;  %s957_s23 = sadd.s32 4294967295, %s884_s22   ;;  %s884_s22 = sphi %s930_s22, %s25_s22   ;;  %s880_s21 = sphi %s928_s21, %s1166_s21   ;;  %s876_s20 = sphi %s926_s20, %s1165_s20   ;;  %s872_s19 = sphi %s924_s19, %s1164_s19   ;;  %s868_s18 = sphi %s922_s18, %s1163_s18   ;;  %s864_s17 = sphi %s920_s17, %s1162_s17   ;;  %s860_s16 = sphi %s918_s16, %s1161_s16   ;;  %s856_s15 = sphi %s916_s15, %s1160_s15  }
   0xe   : > { %p535_p0 = scmp.ge.s32.totalorder %s884_s22, 1  ;;  %p60_p1 = scmp.eq.s32.totalorder %s957_s23, 0 }
   0xf   : > { %p175_p2 = scmp.lt.s32.totalorder %s884_s22, 5  ;;  %s1145_s1 = sld [smem:[#allocation19_spill]] }
  0x10   : > { %s886_s28 = smov [#allocation5]   ;;  %s887_s30 = smov 128  }
  0x11   : > { %p965_p3 = pnand %p535_p0, %p175_p2  ;;  %s188_s29 = sshll.u32 %s886_s28, 4  ;;  %s189_s29 = int_to_ptr.vmem [resolvable:$true] %s188_s29 }
  0x12   : > { %s888_s5 = smov 8   ;;  %s1136_s6 = sadd.s32 4294967294, %s884_s22  }
  0x13   : > { %p571_p4 = pneg %p965_p3  ;;  %s34_s7 = sadd.s32 1, %s876_s20 }
  0x14   : > { %s37_s8 = sadd.s32 1, %s880_s21  ;;  %p35_p6 = scmp.ge.s32.totalorder %s34_s7, 2 }
  0x15   : > { %s186_s26 = sshll.u32 %s1145_s1, 4  ;;  %p572_p5 = pnand %p571_p4, %p60_p1  ;;  %s187_s26 = int_to_ptr.hbm [resolvable:$true] %s186_s26 }
  0x16   : > { %s46_s9 = sadd.s32 1, %s864_s17  ;;  %p53_p7 = scmp.ne.s32.totalorder %s864_s17, %s860_s16 }
  0x17   : > { %574 = dma.hbm_to_vmem [thread:$0]  (!%p572_p5), %s187_s26, 512, %s189_s29, [#allocation6], %s887_s30, %s887_s30, %s888_s5  }
  0x18   : > { %p54_p8 = scmp.eq.s32.totalorder %s884_s22, 0  ;;  %s1168_s7 = smov (%p35_p6, %s34_s7), 0 }
  0x19   : > { %1147 = sst [smem:[#allocation16_spill]] %s1168_s7  ;;  %s1170_s8 = smov (!%p35_p6, %s37_s8), %s880_s21 }
  0x1a   : > { %s42_s10 = ssub.s32 %s876_s20, %s1168_s7  ;;  %p985_p9 = por %p54_p8, %p53_p7 }
  0x1b   : > { %p39_p10 = scmp.ge.s32.totalorder %s1170_s8, 2  ;;  %p59_p11 = scmp.ne.s32.totalorder %s860_s16, %s856_s15 }
  0x1c   : > { %p106_p12 = scmp.eq.s32.totalorder %s957_s23, 3  ;;  %p112_p13 = scmp.eq.s32.totalorder %s1136_s6, 3 }
  0x1d   : > { %s1172_s8 = smov (%p39_p10, %s1170_s8), 0  ;;  %p998_p0 = por %p60_p1, %p59_p11 }
  0x1e   : > { %1149 = sst [smem:[#allocation17_spill]] %s1172_s8  ;;  %p1002_p2 = por %p106_p12, %p53_p7 }
  0x1f   : > { %s41_s14 = ssub.s32 %s880_s21, %s1172_s8  ;;  %p1008_p4 = por %p112_p13, %p59_p11 }
  0x20   : > { %s43_s25 = sor.u32 %s42_s10, %s41_s14  ;;  %p590_p5 = scmp.lt.s32.totalorder %s884_s22, 4 }
  0x21   : > { %s1152_s24 = scalar_select %p1008_p4, 1, 0 }
  0x22   : > { %p44_p6 = scmp.eq.s32.totalorder %s43_s25, 0  ;;  %s202_s26 = sand.u32 1, %s864_s17  }
  0x23   : > { %1153 = sst [smem:[#allocation18_spill]] %s1152_s24  ;;  %s538_s28 = sshll.u32 %s202_s26, 3 }
  0x24   : > { %s1015_s29 = scalar_select %p44_p6, %s864_s17, %s46_s9  }
  0x25   : > { %s539_s30 = sshll.u32 %s880_s21, 1  ;;  %s206_s6 = scalar_lea.vmem [#allocation2], %s538_s28 }
  0x26   : > { %s210_s5 = sadd.s32 %s876_s20, %s539_s30  ;;  %s216_s1 = sshll.u32 %s206_s6, 4  ;;  %s217_s1 = int_to_ptr.vmem [resolvable:$true] %s216_s1 }
  0x27   : > { %s540_s7 = sshll.u32 %s210_s5, 3  ;;  %p576_p7 = pnand %p590_p5, %p985_p9 }
  0x28   : > { %s212_s8 = scalar_lea.hbm %s1131_s0, %s540_s7  ;;  %s203_s10 = scalar_lea.sflag [#allocation3], %s202_s26 }
  0x29   : > { %s214_s24 = sshll.u32 %s212_s8, 4  ;;  %225 = sbr.rel (%p965_p3) target bundleno = 314 (0x13a), region = 28  ;;  %s215_s24 = int_to_ptr.hbm [resolvable:$true] %s214_s24 }
  0x2a   : > { %578 = dma.hbm_to_vmem [thread:$0]  (!%p576_p7), %s215_s24, 128, %s217_s1, %s203_s10  }
  0x2b   : > { %s1027_s9 = sand.u32 (!%p965_p3), 1, %s860_s16  }
  0x2c   : > { %s1030_s6 = sshll.u32 (!%p965_p3), %s1027_s9, 3  ;;  %s228_s4 = scalar_lea.sflag (!%p965_p3), [#allocation3], %s1027_s9 }
  0x2d   : > { %s231_s15 = scalar_lea.vmem (!%p965_p3), [#allocation2], %s1030_s6 }
  0x2e   : > { %839 = dma.done.wait (%p998_p0), %s228_s4, 128  }
  0x2f   : > { %841 = vsyncadd (%p998_p0), %s228_s4, 4294967168 }
  0x30   : > { %843 = dma.done.wait (%p60_p1), [#allocation6], 512  }
  0x31   : > { %845 = vsyncadd (%p60_p1), [#allocation6], 4294966784  ;;  %v276_v0 = vld [vmem:[#allocation5 + $0x18] sm:$0xff]  ;;  %v275_v1 = vld [vmem:[#allocation5 + $0x10] sm:$0xff]  ;;  %vm277_vm0 = vcmask 261120   ;;  %s551_s1 = sshll.u32 %s872_s19, 1 }
  0x32   : > { %293 = vmatpush.msra.mxu0 %v276_v0  ;;  %v274_v2 = vld [vmem:[#allocation5 + $0x8] sm:$0xff]  ;;  %v273_v3 = vld [vmem:[#allocation5] sm:$0xff]  ;;  %v272_v4 = vld [vmem:[%s231_s15] sm:$0xff]  ;;  %s332_s27 = sadd.s32 %s868_s18, %s551_s1  ;;  %s257_s14 = scalar_lea.vmem [#allocation7], %s1030_s6 }
  0x33   : > { %s1045_s7 = sshll.u32 %s332_s27, 3  ;;  %s336_s24 = sshll.u32 %s257_s14, 4  ;;  %s337_s24 = int_to_ptr.vmem [resolvable:$true] %s336_s24 }
  0x34   : > { %294 = vmatpush.msra.mxu0 %v275_v1  ;;  %s334_s12 = scalar_lea.hbm %s1133_s2, %s1045_s7  ;;  %s889_s26 = smov 96  }
  0x35   : > { %s338_s25 = sshll.u32 %s334_s12, 4  ;;  %s312_s19 = scalar_lea.sflag [#allocation4], %s1027_s9  ;;  %s339_s25 = int_to_ptr.hbm [resolvable:$true] %s338_s25 }
  0x36   : > { %295 = vmatpush.msra.mxu0 %v274_v2  ;;  %s736_s18 = sshra.s32 %s339_s25, 4  ;;  %s742_s10 = scalar_lea.hbm %s1133_s2, 32  ;;  %s737_s18 = int_to_ptr.hbm [resolvable:$true] %s736_s18 }
  0x37   : > { %s738_s28 = scalar_lea.hbm %s737_s18, 8  ;;  %p743_p9 = scmp.lt.s32.totalorder %s737_s18, %s1133_s2 }
  0x38   : > { %296 = vmatpush.msra.mxu0 %v273_v3  ;;  %p739_p1 = scmp.ne.s32.totalorder %s737_s18, %s738_s28  ;;  %p744_p10 = scmp.lt.s32.totalorder %s742_s10, %s738_s28 }
  0x39   : > { %547 = vmatmul.msk.f32.vlgmr.msra.gmra.mxu0 %vm277_vm0, %v272_v4 }
  0x3a   : > { %p740_p3 = pnand %p739_p1, %p1002_p2  ;;  %p745_p11 = por %p744_p10, %p743_p9 }
  0x3c   : > { %p741_p8 = pneg %p740_p3 }
  0x3e   : > { %p746_p12 = pnand %p745_p11, %p741_p8 }
  0xb6   : > { %v298_v5 = vpop.f32.mrf.mxu0 }
  0xb7   : > { %301 = vst.msk [vmem:[%s257_s14] sm:$0xff] %vm277_vm0, %v298_v5  ;;  %303 = vrot.lane.b32.xlu0 %v298_v5, %s889_s26 }
  0xb8   : > { %749 = shalt.err (!%p746_p12)
}
  0xb9   : > { %565 = dma.vmem_to_hbm [thread:$0]  (%p1002_p2), %s337_s24, 128, %s339_s25, %s312_s19  }
  0xba   : > { %s890_s9 = smov 64   ;;  %s350_s8 = scalar_lea.hbm %s1134_s3, %s1045_s7 }
  0xbb   : > { %s316_s11 = sand.u32 1, %s957_s23   ;;  %s264_s12 = scalar_lea.vmem [#allocation8], %s1030_s6 }
  0xbc   : > { %s352_s14 = sshll.u32 %s264_s12, 4  ;;  %s354_s26 = sshll.u32 %s350_s8, 4  ;;  %s353_s14 = int_to_ptr.vmem [resolvable:$true] %s352_s14  ;;  %s355_s26 = int_to_ptr.hbm [resolvable:$true] %s354_s26 }
  0xbd   : > { %s1154_s30 = sld [smem:[#allocation20_spill]]  ;;  %s1075_s25 = scalar_lea.sflag [#allocation9], %s316_s11 }
  0xbe   : > { %s764_s19 = sshra.s32 %s355_s26, 4  ;;  %s770_s4 = scalar_lea.hbm %s1134_s3, 32  ;;  %s765_s19 = int_to_ptr.hbm [resolvable:$true] %s764_s19 }
  0xbf   : > { %307 = vrot.lane.b32.xlu0 %v298_v5, %s890_s9  ;;  %s766_s5 = scalar_lea.hbm %s765_s19, 8  ;;  %p771_p6 = scmp.lt.s32.totalorder %s765_s19, %s1134_s3 }
  0xc0   : > { %p767_p13 = scmp.ne.s32.totalorder %s765_s19, %s766_s5  ;;  %p772_p7 = scmp.lt.s32.totalorder %s770_s4, %s766_s5 }
  0xc2   : > { %p768_p0 = pnand %p767_p13, %p1002_p2  ;;  %p773_p1 = por %p772_p7, %p771_p6 }
  0xc3   : > { %s366_s24 = scalar_lea.hbm %s1154_s30, %s1045_s7 }
  0xc4   : > { %p769_p5 = pneg %p768_p0 }
  0xc6   : > { %p774_p3 = pnand %p773_p1, %p769_p5 }
 0x129   : > { %v304_v6 = vpop.permute.xlu0 %303 }
 0x12a   : > { %306 = vst.msk [vmem:[%s264_s12] sm:$0xff] %vm277_vm0, %v304_v6 }
 0x12b   : > { %777 = shalt.err (!%p774_p3)
}
 0x12c   : > { %566 = dma.vmem_to_hbm [thread:$0]  (%p1002_p2), %s353_s14, 128, %s355_s26, %s1075_s25  }
 0x12d   : > { %s271_s7 = scalar_lea.vmem [#allocation10], %s1030_s6  ;;  %s370_s27 = sshll.u32 %s366_s24, 4  ;;  %s371_s27 = int_to_ptr.hbm [resolvable:$true] %s370_s27 }
 0x12e   : > { %s368_s1 = sshll.u32 %s271_s7, 4  ;;  %s792_s8 = sshra.s32 %s371_s27, 4  ;;  %s369_s1 = int_to_ptr.vmem [resolvable:$true] %s368_s1  ;;  %s793_s8 = int_to_ptr.hbm [resolvable:$true] %s792_s8 }
 0x12f   : > { %s794_s11 = scalar_lea.hbm %s793_s8, 8  ;;  %s798_s28 = scalar_lea.hbm %s1154_s30, 32 }
 0x130   : > { %p795_p8 = scmp.ne.s32.totalorder %s793_s8, %s794_s11  ;;  %p799_p11 = scmp.lt.s32.totalorder %s793_s8, %s1154_s30 }
 0x131   : > { %v308_v7 = vpop.permute.xlu0 %307  ;;  %p800_p12 = scmp.lt.s32.totalorder %s798_s28, %s794_s11 }
 0x132   : > { %310 = vst.msk [vmem:[%s271_s7] sm:$0xff] %vm277_vm0, %v308_v7  ;;  %p796_p9 = pnand %p795_p8, %p1002_p2 }
 0x133   : > { %p801_p13 = por %p800_p12, %p799_p11 }
 0x134   : > { %p797_p10 = pneg %p796_p9 }
 0x136   : > { %p802_p0 = pnand %p801_p13, %p797_p10 }
 0x138   : > { %805 = shalt.err (!%p802_p0)
}
 0x139   : > { %567 = dma.vmem_to_hbm [thread:$0]  (%p1002_p2), %s369_s1, 128, %s371_s27, %s1075_s25  }
 0x13a PF: > { %s1155_s26 = sld [smem:[#allocation15_spill]]  ;;  %p592_p5 = scmp.ge.s32.totalorder %s884_s22, 2 }
 0x13c   : > { %p580_p6 = pnand %p592_p5, %p1008_p4 }
 0x13e   : > { %p581_p7 = pneg %p580_p6 }
 0x140   : > { %s382_s19 = sand.u32 1, %s1155_s26  }
 0x141   : > { %s383_s5 = scalar_lea.sflag [#allocation4], %s382_s19 }
 0x142   : > { %847 = dma.done.wait (%p581_p7), %s383_s5, 128  }
 0x143   : > { %849 = vsyncadd (%p581_p7), %s383_s5, 4294967168  ;;  %s1157_s23 = sadd.s32 4294967294, %s884_s22  }
 0x144   : > { %s392_s10 = sand.u32 1, %s1157_s23  }
 0x145   : > { %s393_s4 = scalar_lea.sflag [#allocation9], %s392_s10 }
 0x146   : > { %851 = dma.done.wait (%p581_p7), %s393_s4, 256  }
 0x147   : > { %853 = vsyncadd (%p581_p7), %s393_s4, 4294967040  ;;  %s25_s22 = sadd.s32 1, %s884_s22   ;;  %s1158_s13 = sld [smem:[#allocation16_spill]] }
 0x148   : > { %p22_p2 = scmp.ge.s32.totalorder %s25_s22, 6   ;;  %s1159_s25 = sld [smem:[#allocation17_spill]] }
 0x149   : > { %s1160_s15 = smov %s860_s16  ;;  %s1161_s16 = smov %s864_s17 }
 0x14a   : > { %s1162_s17 = smov %s1015_s29  ;;  %s1163_s18 = smov %s876_s20 }
 0x14b   : > { %s1164_s19 = smov %s880_s21  ;;  %24 = sbr.rel (!%p22_p2) target bundleno = 13 (0xd), region = 109 }
 0x14d   : > { %s1165_s20 = smov %s1158_s13 }
 0x14e   : > { %s1166_s21 = smov %s1159_s25 }
 0x150   :  { %409 = vsyncpa [#allocation3], 1 }
 0x151   :  { %411 = vsyncpa [#allocation3 + $0x1], 1 }
 0x152   :  { %412 = vsyncpa [#allocation6], 1 }
 0x153   :  { %413 = vsyncpa [#allocation4], 1 }
 0x154   :  { %415 = vsyncpa [#allocation4 + $0x1], 1 }
 0x155   :  { %416 = vsyncpa [#allocation9], 1 }
 0x156   :  { %418 = vsyncpa [#allocation9 + $0x1], 1 }

</bundles_post_ra>
